<compile_context>
chip_gen: v5e
topology: v5e:2x2
jax: 0.10.0
libtpu: 0.0.40
codegen_flags: <defaults>
</compile_context>

<pallas_src>
import functools

import jax
import jax.numpy as jnp
from jax import lax
from jax.experimental import pallas as pl
from jax.experimental.pallas import tpu as pltpu


_FUSED_MAX_BLOCK_BYTES = 6 * 1024 * 1024      # per in/out buffer (x2 streams x2 bufs ~ 24 MiB)
_FUSED_TARGET_BLOCK_BYTES = 2 * 1024 * 1024   # amortize the ~0.35 us per-grid-step overhead
_TWO_PHASE_STREAM_BUDGET = 24 * 1024 * 1024   # total for double-buffered big streams
_DEFAULT_SCOPED_VMEM = 16 * 1024 * 1024       # conservative default scoped-VMEM limit
_MAX_VMEM_LIMIT = 48 * 1024 * 1024            # leaves ~25% headroom on v7x's 64 MiB


def _gate_from_pooled(pooled, w, bias, c_mid):
    """fc1 -> ReLU -> fc2 -> sigmoid on an (Nb, C) pooled block.

    w:    (2*Cmid, C)  rows [0:Cmid] = fc1 weight, rows [Cmid:] = fc2 weight^T
    bias: (1, Cmid+C)  packed [b1 | b2]
    """
    w = w.astype(jnp.float32)
    bias = bias.astype(jnp.float32)
    w1 = w[:c_mid, :]          # (Cmid, C)
    w2t = w[c_mid:, :]         # (Cmid, C) == fc2 weight transposed
    b1 = bias[:, :c_mid]       # (1, Cmid)
    b2 = bias[:, c_mid:]       # (1, C)
    if c_mid >= 8:
        # Two small MXU matmuls; the MXU slot is otherwise idle in this kernel.
        h = lax.dot_general(pooled, w1, (((1,), (1,)), ((), ())),
                            preferred_element_type=jnp.float32)      # (Nb, Cmid)
        h = jnp.maximum(h + b1, 0.0)
        g = lax.dot_general(h, w2t, (((1,), (0,)), ((), ())),
                            preferred_element_type=jnp.float32)      # (Nb, C)
    else:
        # Tiny Cmid: unrolled rank-1 accumulation on the VPU/XLU (an (Nb,C)x(C,2)
        # matmul is <0.1% MXU utilization and not worth the result-FIFO latency).
        g = jnp.zeros(pooled.shape, jnp.float32)
        for m in range(c_mid):
            h_m = jnp.sum(pooled * w1[m:m + 1, :], axis=-1, keepdims=True)  # (Nb, 1)
            h_m = jnp.maximum(h_m + b1[:, m:m + 1], 0.0)                    # ReLU(fc1)
            g = g + h_m * w2t[m:m + 1, :]                                   # rank-1 fc2
    return jax.nn.sigmoid(g + b2)                                           # (Nb, C)


def _fused_gate_kernel(x_ref, w_ref, bias_ref, o_ref, *, c_mid, inv_hw):
    """pool + fc1/ReLU/fc2/sigmoid + modulate on one resident (Nb, C, HW) block."""
    x = x_ref[...]                                                    # (Nb, C, HW)
    pooled = jnp.sum(x.astype(jnp.float32), axis=-1) * inv_hw         # (Nb, C)
    gate = _gate_from_pooled(pooled, w_ref[...], bias_ref[...], c_mid)
    o_ref[...] = x * gate[:, :, None].astype(o_ref.dtype)


def _gate_kernel(x_ref, w_ref, bias_ref, gate_ref, acc_ref, *, c_mid, inv_hw):
    """Per-sample global-avg-pool accumulated over spatial tiles + the tiny FCs.

    Grid: (N, n_hw) with the batch axis "parallel" and the spatial axis
    "arbitrary".  acc_ref is a (1, C) f32 scratch accumulating the spatial sum.
    """
    h = pl.program_id(1)

    @pl.when(h == 0)
    def _():
        acc_ref[...] = jnp.zeros_like(acc_ref)

    acc_ref[...] += jnp.sum(x_ref[...].astype(jnp.float32), axis=-1)  # (1, C)

    @pl.when(h == pl.num_programs(1) - 1)
    def _():
        pooled = acc_ref[...] * inv_hw
        gate = _gate_from_pooled(pooled, w_ref[...], bias_ref[...], c_mid)
        gate_ref[...] = gate[:, :, None]


def _modulate_kernel(x_ref, gate_ref, o_ref):
    # x_ref / o_ref: (1, C, T);  gate_ref: (1, C, 1).  Multiply in the input
    # dtype (gate cast once per block) -> no f32 upcast of the streamed slab.
    o_ref[...] = x_ref[...] * gate_ref[...].astype(o_ref.dtype)


def _pick_spatial_tile(hw, c, itemsize, n_streams, budget_bytes):
    """Largest multiple-of-128 tile dividing hw whose double-buffered streams fit."""
    best = 128
    for t in range(128, hw + 1, 128):
        if hw % t == 0 and 2 * n_streams * c * t * itemsize <= budget_bytes:
            best = t
    return best


def _compiler_params(semantics, vmem_need_bytes):
    """Raise the scoped-VMEM limit only when the chosen blocks actually need it."""
    kwargs = dict(dimension_semantics=semantics)
    if vmem_need_bytes > _DEFAULT_SCOPED_VMEM:
        kwargs["vmem_limit_bytes"] = int(
            min(max(vmem_need_bytes + (8 << 20), 32 << 20), _MAX_VMEM_LIMIT))
    return pltpu.CompilerParams(**kwargs)


def channel_gate(x, w1, b1, w2, b2, *, force_two_phase=False):
    """ChannelGate forward: x * sigmoid(fc2(relu(fc1(avgpool(x))))).

    x: (N, C, H, W);  w1: (Cmid, C);  b1: (Cmid,);  w2: (C, Cmid);  b2: (C,).
    """
    N, C, H, W = x.shape
    Cmid = w1.shape[0]
    HW = H * W
    itemsize = x.dtype.itemsize

    x_flat = x.reshape(N, C, HW)

    # fc1 weight and fc2 weight^T packed into one block, both biases into
    # another -> only 3 input streams, weights stay resident across steps.
    w_stack = jnp.concatenate([w1, w2.T], axis=0).astype(jnp.float32)          # (2*Cmid, C)
    bias_packed = jnp.concatenate([b1, b2]).reshape(1, Cmid + C).astype(jnp.float32)

    per_sample_bytes = C * HW * itemsize

    if per_sample_bytes <= _FUSED_MAX_BLOCK_BYTES and not force_two_phase:
        # ----- Fused path: one kernel, x read once / written once. -----------
        nb = 1
        for d in range(1, N + 1):
            if N % d:
                continue
            if d * per_sample_bytes > _FUSED_MAX_BLOCK_BYTES:
                break
            nb = d
            if d * per_sample_bytes >= _FUSED_TARGET_BLOCK_BYTES:
                break

        cost = pl.CostEstimate(
            flops=int(2 * N * C * HW + 4 * N * Cmid * C),
            transcendentals=int(N * C),
            bytes_accessed=int(2 * N * C * HW * itemsize + (2 * Cmid * C + Cmid + C) * 4),
        )
        out_flat = pl.pallas_call(
            functools.partial(_fused_gate_kernel, c_mid=Cmid, inv_hw=1.0 / HW),
            out_shape=jax.ShapeDtypeStruct((N, C, HW), x.dtype),
            grid_spec=pltpu.PrefetchScalarGridSpec(
                num_scalar_prefetch=0,
                grid=(N // nb,),
                in_specs=[
                    pl.BlockSpec((nb, C, HW), lambda i: (i, 0, 0)),
                    pl.BlockSpec((2 * Cmid, C), lambda i: (0, 0)),
                    pl.BlockSpec((1, Cmid + C), lambda i: (0, 0)),
                ],
                out_specs=pl.BlockSpec((nb, C, HW), lambda i: (i, 0, 0)),
            ),
            compiler_params=_compiler_params(("parallel",), 4 * nb * per_sample_bytes),
            cost_estimate=cost,
        )(x_flat, w_stack, bias_packed)
        # TODO(synk): add input_output_aliases={0: 0} when the caller donates x
        # (not done here: callers of ChannelGate may still need x alive).
        return out_flat.reshape(N, C, H, W)

    # ----- Two-phase fallback: per-sample slab too large to keep resident. ---
    HW_true = HW
    if HW % 128 != 0:
        # Zero-pad the spatial axis up to a lane multiple: zeros don't perturb
        # the pooled sum (we divide by the true HW) and the padded output
        # columns are sliced off afterwards.
        hw_pad = ((HW + 127) // 128) * 128
        x_flat = jnp.pad(x_flat, ((0, 0), (0, 0), (0, hw_pad - HW)))
        HW = hw_pad

    t_gate = _pick_spatial_tile(HW, C, itemsize, n_streams=1,
                                budget_bytes=_TWO_PHASE_STREAM_BUDGET)
    t_mod = _pick_spatial_tile(HW, C, itemsize, n_streams=2,
                               budget_bytes=_TWO_PHASE_STREAM_BUDGET)

    gate_cost = pl.CostEstimate(
        flops=int(N * C * HW_true + 4 * N * Cmid * C),
        transcendentals=int(N * C),
        bytes_accessed=int(N * C * HW * itemsize + (2 * Cmid * C + Cmid + C + N * C) * 4),
    )
    gates = pl.pallas_call(
        functools.partial(_gate_kernel, c_mid=Cmid, inv_hw=1.0 / HW_true),
        out_shape=jax.ShapeDtypeStruct((N, C, 1), jnp.float32),
        grid_spec=pltpu.PrefetchScalarGridSpec(
            num_scalar_prefetch=0,
            grid=(N, HW // t_gate),
            in_specs=[
                pl.BlockSpec((1, C, t_gate), lambda n, h: (n, 0, h)),
                pl.BlockSpec((2 * Cmid, C), lambda n, h: (0, 0)),
                pl.BlockSpec((1, Cmid + C), lambda n, h: (0, 0)),
            ],
            out_specs=pl.BlockSpec((1, C, 1), lambda n, h: (n, 0, 0)),
            scratch_shapes=[pltpu.VMEM((1, C), jnp.float32)],
        ),
        compiler_params=_compiler_params(("parallel", "arbitrary"),
                                         2 * C * t_gate * itemsize),
        cost_estimate=gate_cost,
    )(x_flat, w_stack, bias_packed)

    mod_cost = pl.CostEstimate(
        flops=int(N * C * HW),
        transcendentals=0,
        bytes_accessed=int(2 * N * C * HW * itemsize + N * C * 4),
    )
    out_flat = pl.pallas_call(
        _modulate_kernel,
        out_shape=jax.ShapeDtypeStruct((N, C, HW), x.dtype),
        grid_spec=pltpu.PrefetchScalarGridSpec(
            num_scalar_prefetch=0,
            grid=(N, HW // t_mod),
            in_specs=[
                pl.BlockSpec((1, C, t_mod), lambda n, h: (n, 0, h)),
                pl.BlockSpec((1, C, 1), lambda n, h: (n, 0, 0)),
            ],
            out_specs=pl.BlockSpec((1, C, t_mod), lambda n, h: (n, 0, h)),
        ),
        compiler_params=_compiler_params(("parallel", "parallel"),
                                         4 * C * t_mod * itemsize),
        cost_estimate=mod_cost,
    )(x_flat, gates)

    if HW != HW_true:
        out_flat = out_flat[:, :, :HW_true]
    return out_flat.reshape(N, C, H, W)


def channel_gate_ref(x, w1, b1, w2, b2):
    """Pure-JAX reference matching the PyTorch ChannelGate.forward."""
    pooled = jnp.mean(x, axis=(2, 3))                        # (N, C)
    h = jnp.maximum(pooled @ w1.T + b1, 0.0)                 # (N, Cmid)
    g = jax.nn.sigmoid(h @ w2.T + b2)                        # (N, C)
    return x * g[:, :, None, None]


if __name__ == "__main__":
    key = jax.random.PRNGKey(0)

    def make_inputs(k, n, c, h, w, reduction):
        cmid = max(c // reduction, 1)
        kx, k1, kb1, k2, kb2 = jax.random.split(k, 5)
        x = jax.random.normal(kx, (n, c, h, w), dtype=jnp.float32)
        # fc1: Conv2d(C, Cmid, 1) weight (Cmid, C, 1, 1) -> (Cmid, C); fc2: (C, Cmid).
        w1 = 0.1 * jax.random.normal(k1, (cmid, c), dtype=jnp.float32)
        b1 = 0.1 * jax.random.normal(kb1, (cmid,), dtype=jnp.float32)
        w2 = 0.1 * jax.random.normal(k2, (c, cmid), dtype=jnp.float32)
        b2 = 0.1 * jax.random.normal(kb2, (c,), dtype=jnp.float32)
        return x, w1, b1, w2, b2

    ka, kb, kc = jax.random.split(key, 3)

    # 1) AINet ChannelGate config after conv2's expansion: C=32, reduction=16 -> Cmid=2.
    #    Exercises the fused single-kernel path with rank-1 FCs.
    x, w1, b1, w2, b2 = make_inputs(ka, 2, 32, 16, 16, 16)
    out = jax.block_until_ready(channel_gate(x, w1, b1, w2, b2))
    ref = channel_gate_ref(x, w1, b1, w2, b2)
    assert out.shape == x.shape
    assert jnp.allclose(out, ref, atol=1e-5, rtol=1e-5), "fused path mismatch"

    # 2) Same channel config with HW not a multiple of 128, forced through the
    #    two-phase fallback (tiled-pool gate kernel + modulate kernel + padding).
    x, w1, b1, w2, b2 = make_inputs(kb, 2, 32, 10, 10, 16)
    out = jax.block_until_ready(channel_gate(x, w1, b1, w2, b2, force_two_phase=True))
    ref = channel_gate_ref(x, w1, b1, w2, b2)
    assert jnp.allclose(out, ref, atol=1e-5, rtol=1e-5), "two-phase path mismatch"

    # 3) Wider-channel config (C=128 -> Cmid=8) exercising the dot_general FC path.
    #    Looser tolerance: the pure-JAX reference matmuls may run at a lower
    #    default matmul precision than the in-kernel f32-accumulated dots.
    x, w1, b1, w2, b2 = make_inputs(kc, 2, 128, 8, 8, 16)
    out = jax.block_until_ready(channel_gate(x, w1, b1, w2, b2))
    ref = channel_gate_ref(x, w1, b1, w2, b2)
    assert jnp.allclose(out, ref, atol=5e-3, rtol=5e-3), "dot-general path mismatch"

    print("KERNEL_OK")
</pallas_src>

<mosaic_0001>
module attributes {stable_mosaic.version = 11 : i64} {
  func.func @_fused_gate_kernel(%arg0: i32, %arg1: memref<2x32x256xf32, #tpu.memory_space<vmem>>, %arg2: memref<4x32xf32, #tpu.memory_space<vmem>>, %arg3: memref<1x34xf32, #tpu.memory_space<vmem>>, %arg4: memref<2x32x256xf32, #tpu.memory_space<vmem>>) attributes {dimension_semantics = [#tpu.dimension_semantics<parallel>], iteration_bounds = array<i64: 1>, scalar_prefetch = 0 : i64, scratch_operands = 0 : i64, tpu.core_type = #tpu.core_type<tc>, window_params = [{transform_indices = @transform_0, window_bounds = array<i64: 2, 32, 256>}, {pipeline_mode = #tpu.pipeline_mode<synchronous>, transform_indices = @transform_1, window_bounds = array<i64: 4, 32>}, {pipeline_mode = #tpu.pipeline_mode<synchronous>, transform_indices = @transform_2, window_bounds = array<i64: 1, 34>}, {transform_indices = @transform_3, window_bounds = array<i64: 2, 32, 256>}]} {
    %c0 = arith.constant 0 : index
    %c0_0 = arith.constant 0 : index
    %c0_1 = arith.constant 0 : index
    %0 = vector.load %arg1[%c0, %c0_0, %c0_1] : memref<2x32x256xf32, #tpu.memory_space<vmem>>, vector<2x32x256xf32>
    %cst = arith.constant dense<0.000000e+00> : vector<2x32xf32>
    %1 = vector.multi_reduction <add>, %0, %cst [2] : vector<2x32x256xf32> to vector<2x32xf32>
    %cst_2 = arith.constant 3.906250e-03 : f32
    %2 = vector.broadcast %cst_2 : f32 to vector<2x32xf32>
    %3 = arith.mulf %1, %2 : vector<2x32xf32>
    %c0_3 = arith.constant 0 : index
    %c0_4 = arith.constant 0 : index
    %4 = vector.load %arg2[%c0_3, %c0_4] : memref<4x32xf32, #tpu.memory_space<vmem>>, vector<4x32xf32>
    %c0_5 = arith.constant 0 : index
    %c0_6 = arith.constant 0 : index
    %5 = vector.load %arg3[%c0_5, %c0_6] : memref<1x34xf32, #tpu.memory_space<vmem>>, vector<1x34xf32>
    %6 = vector.extract_strided_slice %4 {offsets = [0, 0], sizes = [2, 32], strides = [1, 1]} : vector<4x32xf32> to vector<2x32xf32>
    %7 = vector.extract_strided_slice %4 {offsets = [2, 0], sizes = [2, 32], strides = [1, 1]} : vector<4x32xf32> to vector<2x32xf32>
    %8 = vector.extract_strided_slice %5 {offsets = [0, 0], sizes = [1, 2], strides = [1, 1]} : vector<1x34xf32> to vector<1x2xf32>
    %9 = vector.extract_strided_slice %5 {offsets = [0, 2], sizes = [1, 32], strides = [1, 1]} : vector<1x34xf32> to vector<1x32xf32>
    %cst_7 = arith.constant 0.000000e+00 : f32
    %10 = vector.broadcast %cst_7 : f32 to vector<2x32xf32>
    %11 = vector.extract_strided_slice %6 {offsets = [0, 0], sizes = [1, 32], strides = [1, 1]} : vector<2x32xf32> to vector<1x32xf32>
    %12 = vector.broadcast %11 : vector<1x32xf32> to vector<2x32xf32>
    %13 = arith.mulf %3, %12 : vector<2x32xf32>
    %cst_8 = arith.constant dense<0.000000e+00> : vector<2xf32>
    %14 = vector.multi_reduction <add>, %13, %cst_8 [1] : vector<2x32xf32> to vector<2xf32>
    %15 = vector.shape_cast %14 : vector<2xf32> to vector<2x1xf32>
    %16 = vector.extract_strided_slice %8 {offsets = [0, 0], sizes = [1, 1], strides = [1, 1]} : vector<1x2xf32> to vector<1x1xf32>
    %17 = vector.broadcast %16 : vector<1x1xf32> to vector<2x1xf32>
    %18 = arith.addf %15, %17 : vector<2x1xf32>
    %cst_9 = arith.constant 0.000000e+00 : f32
    %19 = vector.broadcast %cst_9 : f32 to vector<2x1xf32>
    %20 = arith.maximumf %18, %19 : vector<2x1xf32>
    %21 = vector.extract_strided_slice %7 {offsets = [0, 0], sizes = [1, 32], strides = [1, 1]} : vector<2x32xf32> to vector<1x32xf32>
    %22 = vector.broadcast %20 : vector<2x1xf32> to vector<2x32xf32>
    %23 = vector.broadcast %21 : vector<1x32xf32> to vector<2x32xf32>
    %24 = arith.mulf %22, %23 : vector<2x32xf32>
    %25 = arith.addf %10, %24 : vector<2x32xf32>
    %26 = vector.extract_strided_slice %6 {offsets = [1, 0], sizes = [1, 32], strides = [1, 1]} : vector<2x32xf32> to vector<1x32xf32>
    %27 = vector.broadcast %26 : vector<1x32xf32> to vector<2x32xf32>
    %28 = arith.mulf %3, %27 : vector<2x32xf32>
    %cst_10 = arith.constant dense<0.000000e+00> : vector<2xf32>
    %29 = vector.multi_reduction <add>, %28, %cst_10 [1] : vector<2x32xf32> to vector<2xf32>
    %30 = vector.shape_cast %29 : vector<2xf32> to vector<2x1xf32>
    %31 = vector.extract_strided_slice %8 {offsets = [0, 1], sizes = [1, 1], strides = [1, 1]} : vector<1x2xf32> to vector<1x1xf32>
    %32 = vector.broadcast %31 : vector<1x1xf32> to vector<2x1xf32>
    %33 = arith.addf %30, %32 : vector<2x1xf32>
    %cst_11 = arith.constant 0.000000e+00 : f32
    %34 = vector.broadcast %cst_11 : f32 to vector<2x1xf32>
    %35 = arith.maximumf %33, %34 : vector<2x1xf32>
    %36 = vector.extract_strided_slice %7 {offsets = [1, 0], sizes = [1, 32], strides = [1, 1]} : vector<2x32xf32> to vector<1x32xf32>
    %37 = vector.broadcast %35 : vector<2x1xf32> to vector<2x32xf32>
    %38 = vector.broadcast %36 : vector<1x32xf32> to vector<2x32xf32>
    %39 = arith.mulf %37, %38 : vector<2x32xf32>
    %40 = arith.addf %25, %39 : vector<2x32xf32>
    %41 = vector.broadcast %9 : vector<1x32xf32> to vector<2x32xf32>
    %42 = arith.addf %40, %41 : vector<2x32xf32>
    %43 = arith.negf %42 : vector<2x32xf32>
    %44 = math.exp %43 : vector<2x32xf32>
    %cst_12 = arith.constant 1.000000e+00 : f32
    %45 = vector.broadcast %cst_12 : f32 to vector<2x32xf32>
    %46 = arith.addf %45, %44 : vector<2x32xf32>
    %47 = arith.divf %45, %46 : vector<2x32xf32>
    %48 = vector.shape_cast %47 : vector<2x32xf32> to vector<2x32x1xf32>
    %49 = vector.broadcast %48 : vector<2x32x1xf32> to vector<2x32x256xf32>
    %50 = arith.mulf %0, %49 : vector<2x32x256xf32>
    %c0_13 = arith.constant 0 : index
    %c0_14 = arith.constant 0 : index
    %c0_15 = arith.constant 0 : index
    %51 = vector.load %arg4[%c0_13, %c0_14, %c0_15] : memref<2x32x256xf32, #tpu.memory_space<vmem>>, vector<2x32x256xf32>
    tpu.vector_store %arg4[%c0_13, %c0_14, %c0_15], %50 {strides = array<i32>} : memref<2x32x256xf32, #tpu.memory_space<vmem>>, vector<2x32x256xf32>,
    return
  }
  func.func @transform_0(%arg0: i32) -> (i32, i32, i32) {
    %c0_i32 = arith.constant 0 : i32
    %c0_i32_0 = arith.constant 0 : i32
    %c0_i32_1 = arith.constant 0 : i32
    return %arg0, %c0_i32, %c0_i32_0 : i32, i32, i32
  }
  func.func @transform_1(%arg0: i32) -> (i32, i32) {
    %c0_i32 = arith.constant 0 : i32
    %c0_i32_0 = arith.constant 0 : i32
    %c0_i32_1 = arith.constant 0 : i32
    return %c0_i32, %c0_i32_0 : i32, i32
  }
  func.func @transform_2(%arg0: i32) -> (i32, i32) {
    %c0_i32 = arith.constant 0 : i32
    %c0_i32_0 = arith.constant 0 : i32
    %c0_i32_1 = arith.constant 0 : i32
    return %c0_i32, %c0_i32_0 : i32, i32
  }
  func.func @transform_3(%arg0: i32) -> (i32, i32, i32) {
    %c0_i32 = arith.constant 0 : i32
    %c0_i32_0 = arith.constant 0 : i32
    %c0_i32_1 = arith.constant 0 : i32
    return %arg0, %c0_i32, %c0_i32_0 : i32, i32, i32
  }
}

</mosaic_0001>

<bundles_post_ra>
// kernel: tpu_custom_call.1
= control target key start
LH: loop header
LB: loop body
LE: loop exit
PB: predicated region body
PF: predicated region fallthrough
CT: control target
= control target key end

     0   :  { %8 = vsyncpa [#allocation3], 0  ;;  %s706_s0 = inlined_call_operand.hbm [shape: f32[2,32,256], index: 0, kind: input, shape index: {}]   ;;  %s707_s1 = inlined_call_operand.hbm [shape: f32[4,32], index: 1, kind: input, shape index: {}]   ;;  %s708_s2 = inlined_call_operand.vmem [shape: f32[1,34], index: 2, kind: input, shape index: {}]   ;;  %s709_s3 = inlined_call_operand.hbm [shape: f32[2,32,256], index: 3, kind: output, shape index: {}]  }
   0x1   :  { %9 = vsyncpa [#allocation6], 0 }
   0x2   :  { %10 = vsyncpa [#allocation4], 0  ;;  %s15_s14 = sshll.u32 %s706_s0, 4  ;;  %s544_s15 = smov [#allocation2]   ;;  %s16_s14 = int_to_ptr.hbm [resolvable:$true] %s15_s14 }
   0x3   :  { %s17_s16 = sshll.u32 %s544_s15, 4  ;;  %s29_s19 = sshll.u32 %s707_s1, 4  ;;  %s18_s16 = int_to_ptr.vmem [resolvable:$true] %s17_s16  ;;  %s30_s19 = int_to_ptr.hbm [resolvable:$true] %s29_s19 }
   0x4   :  { %s545_s20 = smov 256   ;;  %s546_s21 = smov 16  }
   0x5   :  { %23 = dma.hbm_to_vmem [thread:$0]  %s16_s14, 2048, %s18_s16, [#allocation3], %s545_s20, %s545_s20, %s546_s21  }
   0x6   :  { %s547_s22 = smov [#allocation5]  }
   0x7   :  { %s31_s23 = sshll.u32 %s547_s22, 4  ;;  %s32_s23 = int_to_ptr.vmem [resolvable:$true] %s31_s23 }
   0x8   :  { %34 = dma.hbm_to_vmem [thread:$0]  %s30_s19, 64, %s32_s23, [#allocation6]  }
   0x9   :  { %538 = dma.done.wait [#allocation3], 2048  }
   0xa   :  { %539 = vsyncadd [#allocation3], 4294965248 }
   0xb   :  { %540 = dma.done.wait [#allocation6], 64  }
   0xc   :  { %541 = vsyncadd [#allocation6], 4294967232  ;;  %v97_v0 = vlaneseq  ;;  %v590_v3 = vld [vmem:[#allocation2 + $0x40] sm:$0xff]  ;;  %v592_v4 = vld [vmem:[#allocation2 + $0x48] sm:$0xff]  ;;  %v548_v32 = vmov 0   ;;  %vm170_vm0 = vcmask 130112  }
   0xd   :  { %v594_v5 = vld [vmem:[#allocation2 + $0x20] sm:$0xff]  ;;  %v73_v6 = vadd.f32 %v592_v4, %v590_v3  ;;  %v598_v7 = vld [vmem:[#allocation2 + $0x28] sm:$0xff]  ;;  %v608_v12 = vld [vmem:[#allocation2 + $0x50] sm:$0xff]  ;;  %vm174_vm1 = vcmask 195712   ;;  %vm178_vm2 = vcmask 261312   ;;  %vm187_vm3 = vcmask 1041409  }
   0xe   :  { %v582_v1 = vshrl.u32 %v97_v0, 7  ;;  %v600_v8 = vld [vmem:[#allocation2] sm:$0xff]  ;;  %v602_v9 = vld [vmem:[#allocation2 + $0x8] sm:$0xff]  ;;  %v67_v10 = vadd.f32 %v598_v7, %v594_v5  ;;  %v610_v13 = vld [vmem:[#allocation2 + $0x58] sm:$0xff]  ;;  %vm190_vm4 = vcmask 254976   ;;  %s550_s24 = smov 126  }
   0xf   :  { %v61_v11 = vadd.f32 %v602_v9, %v600_v8  ;;  %74 = vadd.xlane.f32.xlu2 %v73_v6  ;;  %v612_v14 = vld [vmem:[#allocation2 + $0x30] sm:$0xff]  ;;  %v614_v15 = vld [vmem:[#allocation2 + $0x38] sm:$0xff]  ;;  %v76_v18 = vadd.f32 %v610_v13, %v608_v12  ;;  %v630_v23 = vld [vmem:[#allocation2 + $0x60] sm:$0xff]  ;;  %s417_s28 = sshll.u32 %s709_s3, 4  ;;  %s418_s28 = int_to_ptr.hbm [resolvable:$true] %s417_s28 }
  0x10   :  { %440 = vset.pattern.permute.xlu2 %v582_v1  ;;  %v586_v2 = vadd.s32 8, %v582_v1  ;;  %442 = vset.pattern.permute.xlu1 %v582_v1  ;;  %v616_v16 = vld [vmem:[#allocation2 + $0x10] sm:$0xff]  ;;  %v618_v17 = vld [vmem:[#allocation2 + $0x18] sm:$0xff]  ;;  %v70_v19 = vadd.f32 %v614_v15, %v612_v14  ;;  %v632_v24 = vld [vmem:[#allocation2 + $0x68] sm:$0xff]  ;;  %v644_v30 = vadd.s32 16, %v582_v1  ;;  %v649_v31 = vadd.s32 24, %v582_v1 }
  0x11   :  { %68 = vadd.xlane.f32.xlu1 %v67_v10  ;;  %62 = vadd.xlane.f32.xlu0 %v61_v11  ;;  %v64_v20 = vadd.f32 %v618_v17, %v616_v16  ;;  %v626_v21 = vld [vmem:[#allocation2 + $0x70] sm:$0xff]  ;;  %v628_v22 = vld [vmem:[#allocation2 + $0x78] sm:$0xff]  ;;  %v79_v26 = vadd.f32 %v632_v24, %v630_v23  ;;  %v638_v27 = vld [vmem:[#allocation5] sm:$0xf] }
  0x12   :  { %441 = vset.pattern.permute.xlu0 %v586_v2  ;;  %v82_v25 = vadd.f32 %v628_v22, %v626_v21  ;;  %v95_v28 = vperm.slane %v638_v27, 0  ;;  %v207_v29 = vperm.slane %v638_v27, 1 }
  0x17   :  { %77 = vadd.xlane.f32.xlu2 %v76_v18 }
  0x19   :  { %71 = vadd.xlane.f32.xlu1 %v70_v19  ;;  %65 = vadd.xlane.f32.xlu0 %v64_v20 }
  0x21   :  { %83 = vadd.xlane.f32.xlu1 %v82_v25  ;;  %80 = vadd.xlane.f32.xlu0 %v79_v26 }
  0x2f   :  { %101 = vperm.xlu2 %440, %v95_v28  }
  0x35   :  { %107 = vperm.xlu0 %441, %v95_v28  }
  0x37   :  { %443 = vset.pattern.permute.xlu2 %v586_v2 }
  0x3a   :  { %213 = vperm.xlu1 %442, %v207_v29  }
  0x3d   :  { %448 = vset.pattern.permute.xlu0 %v548_v32 }
  0x3f   :  { %219 = vperm.xlu2 %443, %v207_v29  }
  0x42   :  { %445 = vset.pattern.permute.xlu1 %v644_v30 }
  0x47   :  { %444 = vset.pattern.permute.xlu2 %v644_v30 }
  0x4a   :  { %225 = vperm.xlu1 %445, %v207_v29  }
  0x4f   :  { %113 = vperm.xlu2 %444, %v95_v28  }
  0x52   :  { %447 = vset.pattern.permute.xlu1 %v649_v31 }
  0x57   :  { %446 = vset.pattern.permute.xlu2 %v649_v31 }
  0x5a   :  { %231 = vperm.xlu1 %447, %v207_v29  }
  0x5f   :  { %119 = vperm.xlu2 %446, %v95_v28  }
  0x62   :  { %449 = vset.pattern.permute.xlu1 %v548_v32 }
  0x67   :  { %450 = vset.pattern.permute.xlu2 %v548_v32 }
  0x82   :  { %v75_v33 = vpop.xlane.xlu2 %74 }
  0x83   :  { %v89_v38 = vmul.f32 0.00390625, %v75_v33 }
  0x84   :  { %v63_v35 = vpop.xlane.xlu0 %62  ;;  %v69_v36 = vpop.xlane.xlu1 %68 }
  0x85   :  { %v85_v37 = vmul.f32 0.00390625, %v63_v35  ;;  %v87_v48 = vmul.f32 0.00390625, %v69_v36 }
  0x8a   :  { %v78_v34 = vpop.xlane.xlu2 %77 }
  0x8b   :  { %v90_v55 = vmul.f32 0.00390625, %v78_v34 }
  0x8c   :  { %v66_v42 = vpop.xlane.xlu0 %65  ;;  %v72_v44 = vpop.xlane.xlu1 %71 }
  0x8d   :  { %v86_v43 = vmul.f32 0.00390625, %v66_v42  ;;  %v88_v19 = vmul.f32 0.00390625, %v72_v44 }
  0x92   :  { %v102_v39 = vpop.permute.xlu2 %101 }
  0x93   :  { %v125_v40 = vmul.f32 %v102_v39, %v85_v37  ;;  %v129_v41 = vmul.f32 %v102_v39, %v89_v38 }
  0x94   :  { %v84_v47 = vpop.xlane.xlu1 %83  ;;  %v81_v49 = vpop.xlane.xlu0 %80 }
  0x95   :  { %154 = vperm.xlu1 %449, %v129_v41   ;;  %142 = vperm.xlu0 %448, %v125_v40   ;;  %v91_v59 = vmul.f32 0.00390625, %v81_v49  ;;  %v92_v10 = vmul.f32 0.00390625, %v84_v47  ;;  %v166_v40 = vand.u32 127, %v97_v0 }
  0x97   :  { %v172_v44 = vadd.s32 4294967280, %v166_v40 }
  0x9a   :  { %v220_v45 = vpop.permute.xlu2 %219 }
  0x9b   :  { %v238_v46 = vmul.f32 %v220_v45, %v86_v43  ;;  %v242_v57 = vmul.f32 %v220_v45, %v90_v55 }
  0x9d   :  { %257 = vperm.xlu0 %448, %v238_v46   ;;  %v176_v46 = vadd.s32 4294967272, %v166_v40 }
  0xa7   :  { %v108_v56 = vpop.permute.xlu0 %107 }
  0xa8   :  { %v126_v58 = vmul.f32 %v108_v56, %v86_v43  ;;  %v130_v63 = vmul.f32 %v108_v56, %v90_v55  ;;  %v168_v43 = vadd.s32 4294967288, %v166_v40 }
  0xa9   :  { %v114_v50 = vpop.permute.xlu2 %113 }
  0xaa   :  { %v127_v51 = vmul.f32 %v114_v50, %v87_v48  ;;  %v131_v18 = vmul.f32 %v114_v50, %v91_v59 }
  0xac   :  { %v214_v52 = vpop.permute.xlu1 %213  ;;  %148 = vperm.xlu0 %448, %v127_v51  }
  0xad   :  { %v237_v53 = vmul.f32 %v214_v52, %v85_v37  ;;  %v241_v54 = vmul.f32 %v214_v52, %v89_v38 }
  0xaf   :  { %266 = vperm.xlu2 %450, %v241_v54   ;;  %254 = vperm.xlu1 %449, %v237_v53  }
  0xb7   :  { %269 = vperm.xlu1 %449, %v242_v57   ;;  %145 = vperm.xlu2 %450, %v126_v58  }
  0xb9   :  { %v120_v6 = vpop.permute.xlu2 %119 }
  0xba   :  { %v132_v11 = vmul.f32 %v120_v6, %v92_v10  ;;  %v128_v26 = vmul.f32 %v120_v6, %v88_v19 }
  0xbc   :  { %v226_v60 = vpop.permute.xlu1 %225 }
  0xbd   :  { %v239_v61 = vmul.f32 %v226_v60, %v87_v48  ;;  %v243_v62 = vmul.f32 %v226_v60, %v91_v59 }
  0xbf   :  { %260 = vperm.xlu1 %449, %v239_v61   ;;  %272 = vperm.xlu0 %448, %v243_v62  }
  0xc0   :  { %157 = vperm.xlu2 %450, %v130_v63  }
  0xc7   :  { %163 = vperm.xlu1 %449, %v132_v11  }
  0xc8   :  { %160 = vperm.xlu2 %450, %v131_v18  }
  0xcc   :  { %v232_v20 = vpop.permute.xlu1 %231 }
  0xcd   :  { %v240_v25 = vmul.f32 %v232_v20, %v88_v19  ;;  %v244_v28 = vmul.f32 %v232_v20, %v92_v10 }
  0xcf   :  { %263 = vperm.xlu0 %448, %v240_v25   ;;  %454 = vset.pattern.permute.xlu1 %v644_v30 }
  0xd0   :  { %151 = vperm.xlu2 %450, %v128_v26  }
  0xd7   :  { %456 = vset.pattern.permute.xlu0 %v582_v1 }
  0xd8   :  { %275 = vperm.xlu2 %450, %v244_v28  }
 0x107   :  { %v155_v33 = vpop.permute.xlu1 %154  ;;  %v143_v34 = vpop.permute.xlu0 %142 }
 0x108   :  { %v180_v51 = vperm.slane %v155_v33, %v166_v40  ;;  %v167_v52 = vperm.slane %v143_v34, %v166_v40 }
 0x109   :  { %v267_v29 = vpop.permute.xlu2 %266 }
 0x10a   :  { %v284_v11 = vperm.slane %v267_v29, %v166_v40 }
 0x10f   :  { %v258_v37 = vpop.permute.xlu0 %257 }
 0x110   :  { %v278_v25 = vperm.slane %v258_v37, %v168_v43  ;;  %v461_v37 = vld [vmem:[%s708_s2] ss:$0 sm:$0xff]  ;;  %s551_s2 = smov [#allocation7]  }
 0x111   :  { %v146_v32 = vpop.permute.xlu2 %145  ;;  %s415_s25 = sshll.u32 %s551_s2, 4  ;;  %s416_s25 = int_to_ptr.vmem [resolvable:$true] %s415_s25 }
 0x112   :  { %v169_v47 = vperm.slane %v146_v32, %v168_v43 }
 0x114   :  { %v171_v0 = vsel %vm170_vm0, %v169_v47, %v167_v52  ;;  %v549_v47 = vmov 1  }
 0x11a   :  { %v158_v35 = vpop.permute.xlu2 %157 }
 0x11b   :  { %v181_v48 = vperm.slane %v158_v35, %v168_v43 }
 0x11d   :  { %v182_v56 = vsel %vm170_vm0, %v181_v48, %v180_v51  ;;  %v204_v51 = vperm.slane %v638_v27, 2 }
 0x11e   :  { %v149_v41 = vpop.permute.xlu0 %148 }
 0x11f   :  { %v173_v49 = vperm.slane %v149_v41, %v172_v44 }
 0x121   :  { %v255_v36 = vpop.permute.xlu1 %254  ;;  %v175_v58 = vsel %vm174_vm1, %v173_v49, %v171_v0  ;;  %v303_v49 = vperm.slane %v638_v27, 3 }
 0x122   :  { %v161_v38 = vpop.permute.xlu2 %160  ;;  %v277_v18 = vperm.slane %v255_v36, %v166_v40 }
 0x123   :  { %v183_v50 = vperm.slane %v161_v38, %v172_v44 }
 0x124   :  { %v279_v34 = vsel %vm170_vm0, %v278_v25, %v277_v18 }
 0x125   :  { %v184_v59 = vsel %vm174_vm1, %v183_v50, %v182_v56 }
 0x129   :  { %v270_v39 = vpop.permute.xlu1 %269 }
 0x12a   :  { %v152_v45 = vpop.permute.xlu2 %151  ;;  %v285_v60 = vperm.slane %v270_v39, %v168_v43 }
 0x12b   :  { %v177_v53 = vperm.slane %v152_v45, %v176_v46 }
 0x12c   :  { %v286_v26 = vsel %vm170_vm0, %v285_v60, %v284_v11 }
 0x12d   :  { %v179_v61 = vsel %vm178_vm2, %v177_v53, %v175_v58 }
 0x131   :  { %v261_v42 = vpop.permute.xlu1 %260  ;;  %v273_v54 = vpop.permute.xlu0 %272 }
 0x132   :  { %v276_v63 = vpop.permute.xlu2 %275  ;;  %v287_v6 = vperm.slane %v273_v54, %v172_v44  ;;  %v280_v20 = vperm.slane %v261_v42, %v172_v44 }
 0x133   :  { %v289_v28 = vperm.slane %v276_v63, %v176_v46 }
 0x134   :  { %v288_v32 = vsel %vm174_vm1, %v287_v6, %v286_v26  ;;  %v281_v38 = vsel %vm174_vm1, %v280_v20, %v279_v34 }
 0x135   :  { %v290_v29 = vsel %vm178_vm2, %v289_v28, %v288_v32 }
 0x139   :  { %v164_v55 = vpop.permute.xlu1 %163 }
 0x13a   :  { %v185_v57 = vperm.slane %v164_v55, %v176_v46 }
 0x13c   :  { %v186_v62 = vsel %vm178_vm2, %v185_v57, %v184_v59 }
 0x13d   :  { %v188_v10 = vsel %vm187_vm3, %v186_v62, %v179_v61 }
 0x13e   :  { %v191_v19 = vsel %vm190_vm4, %v188_v10, 0.0 }
 0x13f   :  { %192 = vadd.xlane.f32.xlu1 %v191_v19 }
 0x141   :  { %v264_v33 = vpop.permute.xlu0 %263 }
 0x142   :  { %v282_v35 = vperm.slane %v264_v33, %v176_v46 }
 0x144   :  { %v283_v39 = vsel %vm178_vm2, %v282_v35, %v281_v38 }
 0x145   :  { %v291_v36 = vsel %vm187_vm3, %v290_v29, %v283_v39 }
 0x146   :  { %v293_v40 = vsel %vm190_vm4, %v291_v36, 0.0 }
 0x147   :  { %294 = vadd.xlane.f32.xlu0 %v293_v40 }
 0x1b2   :  { %v193_v41 = vpop.xlane.xlu1 %192 }
 0x1b3   :  { %v197_v42 = vadd.f32 %v461_v37, %v193_v41 }
 0x1b5   :  { %v198_v43 = vmax.f32 %v197_v42, 0.0 }
 0x1b7   :  { %201 = vperm.xlu2 %450, %v198_v43  }
 0x1ba   :  { %v295_v44 = vpop.xlane.xlu0 %294 }
 0x1bb   :  { %v296_v45 = vadd.f32 %v461_v37, %v295_v44 }
 0x1bd   :  { %v297_v46 = vmax.f32 %v296_v45, 0.0 }
 0x1bf   :  { %451 = vset.pattern.permute.xlu2 %v549_v47 }
 0x1c0   :  { %300 = vperm.xlu2 %451, %v297_v46  }
 0x1c8   :  { %306 = vrot.lane.b32.xlu2 %v461_v37, %s550_s24 }
 0x1c9   :  { %452 = vset.pattern.permute.xlu2 %v582_v1 }
 0x211   :  { %v202_v48 = vpop.permute.xlu2 %201 }
 0x212   :  { %v205_v53 = vmul.f32 %v204_v51, %v202_v48 }
 0x21a   :  { %v301_v50 = vpop.permute.xlu2 %300 }
 0x21b   :  { %v304_v52 = vmul.f32 %v303_v49, %v301_v50 }
 0x21d   :  { %v305_v54 = vadd.f32 %v304_v52, %v205_v53 }
 0x222   :  { %v307_v55 = vpop.permute.xlu2 %306 }
 0x223   :  { %v309_v0 = vadd.f32 %v307_v55, %v305_v54 }
 0x225   :  { %v431_v56 = vmul.f32 -1.442695, %v309_v0 }
 0x227   :  { %462 = vpow2.f32 %v431_v56 }
 0x22d   :  { %v463_v57 = vpop.eup %462 }
 0x22e   :  { %v313_v58 = vadd.f32 1.0, %v463_v57 }
 0x230   :  { %464 = vrcp.f32 %v313_v58  ;;  %v325_v1 = vand.u32 2147483648, %v313_v58  ;;  %v323_v63 = vand.u32 2147483647, %v313_v58  ;;  %vm319_vm6 = vweird.f32 %v313_v58 }
 0x232   :  { %v326_v27 = vor.u32 1.1754944e-38, %v325_v1  ;;  %vm324_vm8 = vcmp.eq.f32.partialorder %v323_v63, 8.507059e+37 }
 0x236   :  { %v465_v59 = vpop.eup %464 }
 0x237   :  { %v315_v60 = vmul.f32 %v465_v59, %v313_v58  ;;  %vm320_vm5 = vweird.f32 %v465_v59 }
 0x238   :  { %vm321_vm7 = vmor %vm319_vm6, %vm320_vm5 }
 0x239   :  { %v316_v61 = vsub.f32 1.0, %v315_v60 }
 0x23b   :  { %v317_v62 = vmul.f32 %v465_v59, %v316_v61 }
 0x23d   :  { %v318_v6 = vadd.f32 %v465_v59, %v317_v62 }
 0x23f   :  { %v322_v10 = vsel %vm321_vm7, %v465_v59, %v318_v6 }
 0x240   :  { %v327_v11 = vsel %vm324_vm8, %v326_v27, %v322_v10 }
 0x241   :  { %v354_v18 = vperm.slane %v327_v11, 1  ;;  %v329_v19 = vperm.slane %v327_v11, 0 }
 0x243   :  { %359 = vperm.xlu0 %456, %v354_v18   ;;  %346 = vperm.xlu1 %454, %v329_v19  }
 0x244   :  { %334 = vperm.xlu2 %452, %v329_v19  }
 0x24b   :  { %459 = vset.pattern.permute.xlu1 %v649_v31  ;;  %460 = vset.pattern.permute.xlu0 %v649_v31 }
 0x24c   :  { %453 = vset.pattern.permute.xlu2 %v586_v2 }
 0x253   :  { %377 = vperm.xlu1 %459, %v354_v18  }
 0x254   :  { %340 = vperm.xlu2 %453, %v329_v19  }
 0x25c   :  { %455 = vset.pattern.permute.xlu2 %v649_v31 }
 0x264   :  { %352 = vperm.xlu2 %455, %v329_v19  }
 0x26c   :  { %457 = vset.pattern.permute.xlu2 %v586_v2 }
 0x274   :  { %365 = vperm.xlu2 %457, %v354_v18  }
 0x27c   :  { %458 = vset.pattern.permute.xlu2 %v644_v30 }
 0x284   :  { %371 = vperm.xlu2 %458, %v354_v18  }
 0x29e   :  { %v335_v20 = vpop.permute.xlu2 %334 }
 0x29f   :  { %v379_v25 = vmul.f32 %v335_v20, %v600_v8  ;;  %v380_v26 = vmul.f32 %v335_v20, %v602_v9 }
 0x2a1   :  { %395 = vst [vmem:[#allocation7] sm:$0xff] %v379_v25 }
 0x2a2   :  { %396 = vst [vmem:[#allocation7 + $0x8] sm:$0xff] %v380_v26 }
 0x2ae   :  { %v341_v28 = vpop.permute.xlu2 %340 }
 0x2af   :  { %v381_v32 = vmul.f32 %v341_v28, %v616_v16  ;;  %v382_v33 = vmul.f32 %v341_v28, %v618_v17 }
 0x2b1   :  { %397 = vst [vmem:[#allocation7 + $0x10] sm:$0xff] %v381_v32 }
 0x2b2   :  { %398 = vst [vmem:[#allocation7 + $0x18] sm:$0xff] %v382_v33 }
 0x2b5   :  { %v360_v31 = vpop.permute.xlu0 %359  ;;  %v347_v2 = vpop.permute.xlu1 %346 }
 0x2b6   :  { %v387_v34 = vmul.f32 %v360_v31, %v590_v3  ;;  %v388_v30 = vmul.f32 %v360_v31, %v592_v4  ;;  %v383_v35 = vmul.f32 %v347_v2, %v594_v5  ;;  %v384_v8 = vmul.f32 %v347_v2, %v598_v7 }
 0x2b8   :  { %403 = vst [vmem:[#allocation7 + $0x40] sm:$0xff] %v387_v34 }
 0x2b9   :  { %404 = vst [vmem:[#allocation7 + $0x48] sm:$0xff] %v388_v30 }
 0x2ba   :  { %399 = vst [vmem:[#allocation7 + $0x20] sm:$0xff] %v383_v35 }
 0x2bb   :  { %400 = vst [vmem:[#allocation7 + $0x28] sm:$0xff] %v384_v8 }
 0x2be   :  { %v353_v9 = vpop.permute.xlu2 %352 }
 0x2bf   :  { %v385_v16 = vmul.f32 %v353_v9, %v612_v14  ;;  %v386_v17 = vmul.f32 %v353_v9, %v614_v15 }
 0x2c1   :  { %401 = vst [vmem:[#allocation7 + $0x30] sm:$0xff] %v385_v16 }
 0x2c2   :  { %402 = vst [vmem:[#allocation7 + $0x38] sm:$0xff] %v386_v17 }
 0x2c5   :  { %v378_v38 = vpop.permute.xlu1 %377 }
 0x2c6   :  { %v393_v3 = vmul.f32 %v378_v38, %v626_v21  ;;  %v394_v4 = vmul.f32 %v378_v38, %v628_v22 }
 0x2c8   :  { %409 = vst [vmem:[#allocation7 + $0x70] sm:$0xff] %v393_v3 }
 0x2c9   :  { %410 = vst [vmem:[#allocation7 + $0x78] sm:$0xff] %v394_v4 }
 0x2ce   :  { %v366_v5 = vpop.permute.xlu2 %365 }
 0x2cf   :  { %v389_v7 = vmul.f32 %v366_v5, %v608_v12  ;;  %v390_v39 = vmul.f32 %v366_v5, %v610_v13 }
 0x2d1   :  { %405 = vst [vmem:[#allocation7 + $0x50] sm:$0xff] %v389_v7 }
 0x2d2   :  { %406 = vst [vmem:[#allocation7 + $0x58] sm:$0xff] %v390_v39 }
 0x2de   :  { %v372_v14 = vpop.permute.xlu2 %371 }
 0x2df   :  { %v391_v15 = vmul.f32 %v372_v14, %v630_v23  ;;  %v392_v21 = vmul.f32 %v372_v14, %v632_v24 }
 0x2e1   :  { %407 = vst [vmem:[#allocation7 + $0x60] sm:$0xff] %v391_v15 }
 0x2e2   :  { %408 = vst [vmem:[#allocation7 + $0x68] sm:$0xff] %v392_v21 }
 0x2e3   :  { %423 = dma.vmem_to_hbm [thread:$0]  %s416_s25, 2048, %s418_s28, [#allocation4], %s545_s20, %s545_s20, %s546_s21  }
 0x2e4   :  { %542 = dma.done.wait [#allocation4], 2048  }
 0x2e5   :  { %543 = vsyncadd [#allocation4], 4294965248 }
 0x2e6   :  { %428 = vsyncpa [#allocation3], 1 }
 0x2e7   :  { %429 = vsyncpa [#allocation6], 1 }
 0x2e8   :  { %430 = vsyncpa [#allocation4], 1 }

</bundles_post_ra>
